<compile_context>
chip_gen: v6e
topology: v6e:2x2x1
jax: 0.10.0
libtpu: 0.0.40
codegen_flags: <defaults>
</compile_context>

<pallas_src>
import jax
import jax.numpy as jnp
from jax.experimental import pallas as pl
from jax.experimental.pallas import tpu as pltpu

BATCH = 2
NUM_CHANNELS = 16      # nn.Embedding num_embeddings (>= max seq_len)
SEQ_LEN = 16           # seq_len of the input (<= NUM_CHANNELS)
EMB = 32               # input_embedding_size

VMEM_SPEC = pl.BlockSpec(memory_space=pltpu.MemorySpace.VMEM)


def pos_add_kernel(x_ref, pos_ref, o_ref):
    # x_ref:   (B, S*E)  lane-dense activation slab
    # pos_ref: (1, S*E)  positional-encoding row, broadcast over the batch rows
    o_ref[...] = x_ref[...] + pos_ref[...]


def learned_positional_encoding(x, pos_table):
    """x: (B, S, E) float32; pos_table: (num_channels, E) nn.Embedding weight."""
    B, S, E = x.shape
    # positions = arange(S): the Embedding lookup is exactly the first S table
    # rows, so it is a static slice (no in-kernel gather needed).
    pos = pos_table[:S]                         # (S, E)

    # Lane-dense presentation: flatten the (S, E) trailing dims so the kernel
    # sees a last dim of S*E (a multiple of 128 here), keeping every load and
    # store an unmasked full-width vector op.
    x_flat = x.reshape(B, S * E)                # (B, S*E)
    pos_flat = pos.reshape(1, S * E)            # (1, S*E)

    out_flat = pl.pallas_call(
        pos_add_kernel,
        out_shape=jax.ShapeDtypeStruct((B, S * E), x.dtype),
        in_specs=[VMEM_SPEC, VMEM_SPEC],
        out_specs=VMEM_SPEC,
    )(x_flat, pos_flat)
    return out_flat.reshape(B, S, E)


if __name__ == "__main__":
    key = jax.random.PRNGKey(0)
    k_x, k_w = jax.random.split(key)

    x = jax.random.normal(k_x, (BATCH, SEQ_LEN, EMB), dtype=jnp.float32)
    # nn.Embedding default initialization: N(0, 1)
    pos_table = jax.random.normal(k_w, (NUM_CHANNELS, EMB), dtype=jnp.float32)

    out = jax.block_until_ready(learned_positional_encoding(x, pos_table))

    # Pure-JAX reference with the same semantics as the PyTorch module.
    ref = x + pos_table[:SEQ_LEN][None, :, :]
    assert out.shape == (BATCH, SEQ_LEN, EMB), out.shape
    assert jnp.allclose(out, ref, atol=1e-6, rtol=1e-6), "mismatch vs reference"
    print("KERNEL_OK")
</pallas_src>

<mosaic_0001>
module attributes {stable_mosaic.version = 11 : i64} {
  func.func @pos_add_kernel(%arg0: memref<2x512xf32, #tpu.memory_space<vmem>>, %arg1: memref<1x512xf32, #tpu.memory_space<vmem>>, %arg2: memref<2x512xf32, #tpu.memory_space<vmem>>) attributes {dimension_semantics = [], scalar_prefetch = 0 : i64, scratch_operands = 0 : i64, tpu.core_type = #tpu.core_type<tc>} {
    %c0 = arith.constant 0 : index
    %c0_0 = arith.constant 0 : index
    %0 = vector.load %arg0[%c0, %c0_0] : memref<2x512xf32, #tpu.memory_space<vmem>>, vector<2x512xf32>
    %c0_1 = arith.constant 0 : index
    %c0_2 = arith.constant 0 : index
    %1 = vector.load %arg1[%c0_1, %c0_2] : memref<1x512xf32, #tpu.memory_space<vmem>>, vector<1x512xf32>
    %2 = vector.broadcast %1 : vector<1x512xf32> to vector<2x512xf32>
    %3 = arith.addf %0, %2 : vector<2x512xf32>
    %c0_3 = arith.constant 0 : index
    %c0_4 = arith.constant 0 : index
    %4 = vector.load %arg2[%c0_3, %c0_4] : memref<2x512xf32, #tpu.memory_space<vmem>>, vector<2x512xf32>
    tpu.vector_store %arg2[%c0_3, %c0_4], %3 {strides = array<i32>} : memref<2x512xf32, #tpu.memory_space<vmem>>, vector<2x512xf32>,
    return
  }
}

</mosaic_0001>

<bundles_post_ra>
// kernel: tpu_custom_call.1
= control target key start
LH: loop header
LB: loop body
LE: loop exit
PB: predicated region body
PF: predicated region fallthrough
CT: control target
= control target key end

     0   :  { %7 = vsyncpa [#allocation3], 0  ;;  %s189_s0 = inlined_call_operand.hbm [shape: f32[2,512], index: 0, kind: input, shape index: {}]   ;;  %s190_s1 = inlined_call_operand.hbm [shape: f32[1,512], index: 1, kind: input, shape index: {}]   ;;  %s191_s2 = inlined_call_operand.hbm [shape: f32[2,512], index: 2, kind: output, shape index: {}]  }
   0x1   :  { %8 = vsyncpa [#allocation6], 0 }
   0x2   :  { %9 = vsyncpa [#allocation4], 0  ;;  %s161_s9 = smov [#allocation2]   ;;  %s162_s11 = smov [#allocation5]  }
   0x3   :  { %s16_s10 = sshll.u32 %s161_s9, 4  ;;  %s26_s12 = sshll.u32 %s162_s11, 4  ;;  %s17_s10 = int_to_ptr.vmem [resolvable:$true] %s16_s10  ;;  %s27_s12 = int_to_ptr.vmem [resolvable:$true] %s26_s12 }
   0x4   :  { %s103_s13 = scalar_lea.vmem %s17_s10, 128  ;;  %p108_p1 = scmp.lt.s32.totalorder %s17_s10, %s17_s10 }
   0x5   :  { %p104_p0 = scmp.ne.s32.totalorder %s17_s10, %s103_s13  ;;  %p109_p2 = scmp.lt.s32.totalorder %s103_s13, %s103_s13 }
   0x7   :  { %p110_p3 = por %p109_p2, %p108_p1 }
   0x9   :  { %p111_p4 = pnand %p110_p3, %p104_p0 }
   0xb   :  { %114 = shalt.err (!%p111_p4)
}
   0xc   :  { %19 = dma.hbm_to_vmem [thread:$0]  %s189_s0, 128, %s17_s10, [#allocation3]  }
   0xd   :  { %s123_s16 = scalar_lea.vmem %s27_s12, 64  ;;  %p128_p6 = scmp.lt.s32.totalorder %s27_s12, %s27_s12 }
   0xe   :  { %p124_p5 = scmp.ne.s32.totalorder %s27_s12, %s123_s16  ;;  %p129_p7 = scmp.lt.s32.totalorder %s123_s16, %s123_s16 }
  0x10   :  { %p130_p8 = por %p129_p7, %p128_p6 }
  0x12   :  { %p131_p9 = pnand %p130_p8, %p124_p5 }
  0x14   :  { %134 = shalt.err (!%p131_p9)
}
  0x15   :  { %29 = dma.hbm_to_vmem [thread:$0]  %s190_s1, 64, %s27_s12, [#allocation6]  }
  0x16   :  { %155 = dma.done.wait [#allocation3], 128  }
  0x17   :  { %156 = vsyncadd [#allocation3], 4294967168 }
  0x18   :  { %157 = dma.done.wait [#allocation6], 64  }
  0x19   :  { %158 = vsyncadd [#allocation6], 4294967232  ;;  %v39_v0 = vlaneseq  ;;  %v163_v1 = vmov 1983009808   ;;  %v37_v9 = vld [vmem:[#allocation5] sm:$0xf] }
  0x1a   :  { %v58_v2 = vunpack.c.l.s4 %v163_v1  ;;  %v36_v19 = vld [vmem:[#allocation2] sm:$0xff]  ;;  %s164_s0 = smov [#allocation7]  }
  0x1b   :  { %v40_v3 = vshrl.u32 %v39_v0, 7  ;;  %s81_s1 = sshll.u32 %s164_s0, 4  ;;  %s82_s1 = int_to_ptr.vmem [resolvable:$true] %s81_s1 }
  0x1c   :  { %v59_v4 = vunpack.c.0.s8 %v58_v2  ;;  %s135_s19 = scalar_lea.vmem %s82_s1, 128  ;;  %p140_p11 = scmp.lt.s32.totalorder %s82_s1, %s82_s1 }
  0x1d   :  { %v41_v5 = vsub.s32 0, %v40_v3  ;;  %v45_v6 = vsub.s32 1, %v40_v3  ;;  %v49_v7 = vsub.s32 2, %v40_v3  ;;  %v53_v8 = vsub.s32 3, %v40_v3  ;;  %p136_p10 = scmp.ne.s32.totalorder %s82_s1, %s135_s19  ;;  %p141_p12 = scmp.lt.s32.totalorder %s135_s19, %s135_s19 }
  0x1e   :  { %v62_v10 = vsub.s32 %v59_v4, %v40_v3 }
  0x1f   :  { %v42_v11 = vrot.slane %v37_v9, %v41_v5  ;;  %v46_v12 = vrot.slane %v37_v9, %v45_v6  ;;  %v50_v13 = vrot.slane %v37_v9, %v49_v7  ;;  %v54_v14 = vrot.slane %v37_v9, %v53_v8  ;;  %p142_p13 = por %p141_p12, %p140_p11 }
  0x21   :  { %v55_v15 = vcombine.low %v42_v11, %v46_v12  ;;  %v56_v16 = vcombine.low %v50_v13, %v54_v14  ;;  %p143_p0 = pnand %p142_p13, %p136_p10 }
  0x23   :  { %v63_v17 = vrot.slane %v55_v15, %v62_v10  ;;  %v70_v18 = vrot.slane %v56_v16, %v62_v10 }
  0x25   :  { %v71_v20 = vcombine.low %v63_v17, %v70_v18 }
  0x27   :  { %v73_v21 = vadd.f32 %v71_v20, %v36_v19 }
  0x29   :  { %74 = vst [vmem:[#allocation7] sm:$0xff] %v73_v21 }
  0x2a   :  { %146 = shalt.err (!%p143_p0)
}
  0x2b   :  { %84 = dma.vmem_to_hbm [thread:$0]  %s82_s1, 128, %s191_s2, [#allocation4]  }
  0x2c   :  { %159 = dma.done.wait [#allocation4], 128  }
  0x2d   :  { %160 = vsyncadd [#allocation4], 4294967168 }
  0x2e   :  { %88 = vsyncpa [#allocation3], 1 }
  0x2f   :  { %89 = vsyncpa [#allocation6], 1 }
  0x30   :  { %90 = vsyncpa [#allocation4], 1 }

</bundles_post_ra>
